<compile_context>
chip_gen: v7x
topology: tpu7x:2x2x1
jax: 0.10.0
libtpu: 0.0.40
codegen_flags: <defaults>
</compile_context>

<pallas_src>
import functools

import numpy as np
import jax
import jax.numpy as jnp
from jax import lax
from jax.experimental import pallas as pl
from jax.experimental.pallas import tpu as pltpu


def _return_loss_kernel(price_ref, weight_ref, bench_ref, band_ref, out_ref, *,
                        window_size, cost, sigma_scale, corr_cost):
    f32 = jnp.float32
    T, N = price_ref.shape
    W = window_size
    L = T - W + 1
    eps = 1e-12

    price = price_ref[...]        # (T, N) f32
    weight = weight_ref[...]      # (T, N) f32
    bench = bench_ref[...]        # (T, 1) f32
    band = band_ref[...]          # (T, T) f32 banded 0/1 (zero rows for t < W-1)

    row = lax.broadcasted_iota(jnp.int32, (T, 1), 0)        # (T, 1) time index
    valid = (row >= W - 1).astype(f32)                      # (T, 1) warm-up mask

    # --- simple returns r[t] = price[t]/price[t-1] - 1, r[0] = 0 -------------
    # exact shift via XLU roll (wrap row masked out), no MXU, no bf16 rounding.
    price_prev = pltpu.roll(price, shift=1, axis=0)          # row 0 wraps (masked)
    safe_prev = jnp.where(price_prev > 0.0, price_prev, 1.0)
    ret = jnp.where((row > 0) & (price_prev > 0.0),
                    price / safe_prev - 1.0, 0.0)            # (T, N)

    # --- rolling sums of [ret, ret^2] with ONE banded MXU matmul -------------
    rhs = jnp.concatenate([ret, ret * ret], axis=1)          # (T, 2N)
    s12 = jnp.dot(band, rhs,
                  precision=lax.Precision.HIGHEST,
                  preferred_element_type=f32)                # (T, 2N)
    s1 = s12[:, :N]
    s2 = s12[:, N:]
    var = (s2 - s1 * s1 / W) / (W - 1)
    sigma = jnp.sqrt(jnp.maximum(var, eps))                  # (T, N); dummy rows t<W-1

    # TODO(synk): `span` (EWM span) of the original vol_adjreturn is unused;
    # a plain rolling-window std is used instead (source of helper unavailable).

    # --- vol-targeted weights + turnover cost --------------------------------
    # Zero out warm-up rows so w_prev at the first valid row is exactly 0
    # (matches the reference, which starts the "previous weight" at zero).
    w_scaled = jnp.where(valid > 0.0,
                         weight * (sigma_scale / (sigma + eps)), 0.0)  # (T, N)
    w_prev = pltpu.roll(w_scaled, shift=1, axis=0)           # w_prev[t] = w_scaled[t-1]

    gross = jnp.sum(w_prev * ret, axis=1, keepdims=True)     # (T, 1)
    tc = cost * jnp.sum(jnp.abs(w_scaled - w_prev), axis=1, keepdims=True)
    ret_df = (gross - tc) * valid                            # invalid rows -> 0

    # --- loss = -mean/std(ddof=1) + corr_cost * |corr(ret_df, benchmark)| ----
    mean_r = jnp.sum(ret_df, keepdims=True) / L              # (1, 1)
    rc = (ret_df - mean_r) * valid
    rr = jnp.sum(rc * rc, keepdims=True)
    std_r = jnp.sqrt(rr / (L - 1))

    mean_b = jnp.sum(bench * valid, keepdims=True) / L
    bc = (bench - mean_b) * valid
    corr = jnp.abs(jnp.sum(rc * bc, keepdims=True)) / jnp.sqrt(
        rr * jnp.sum(bc * bc, keepdims=True) + eps)

    out_ref[...] = (-mean_r / std_r + corr_cost * corr).astype(f32)


def _make_band(T, W):
    """Host-side banded 0/1 matrix: band[t, j] = 1 iff t >= W-1 and t-W+1 <= j <= t."""
    t = np.arange(T)[:, None]
    j = np.arange(T)[None, :]
    band = (j <= t) & (j >= t - (W - 1)) & (t >= W - 1)
    return jnp.asarray(band.astype(np.float32))


def return_loss_pallas(price, weight_df, benchmark, *, window_size, cost,
                       sigma_scale, corr_cost):
    # TODO(synk): if this loss is evaluated for many tickers / hyper-param sets,
    # batch them on the lane axis (or a "parallel" grid axis for v7x's 2 TCs) to
    # amortize the per-call launch/DMA overhead that dominates at T=64, N=4.
    T, _ = price.shape
    band = _make_band(T, window_size)
    kernel = functools.partial(
        _return_loss_kernel, window_size=window_size, cost=cost,
        sigma_scale=sigma_scale, corr_cost=corr_cost)
    out = pl.pallas_call(
        kernel,
        out_shape=jax.ShapeDtypeStruct((1, 1), jnp.float32),
        in_specs=[pl.BlockSpec(memory_space=pltpu.MemorySpace.VMEM)] * 4,
        out_specs=pl.BlockSpec(memory_space=pltpu.MemorySpace.VMEM),
    )(price.astype(jnp.float32), weight_df.astype(jnp.float32),
      benchmark.astype(jnp.float32), band)
    return out[0, 0]


def return_loss_ref(price, weight_df, benchmark, *, window_size, cost,
                    sigma_scale, corr_cost):
    """Pure-JAX reference with identical semantics (for sanity checking)."""
    T, N = price.shape
    W = window_size
    L = T - W + 1
    eps = 1e-12
    ret = jnp.concatenate(
        [jnp.zeros((1, N), jnp.float32), price[1:] / price[:-1] - 1.0], axis=0)
    idx = jnp.arange(L)[:, None] + jnp.arange(W)[None, :]            # (L, W)
    win = ret[idx]                                                   # (L, W, N)
    var = jnp.var(win, axis=1, ddof=1)
    sigma = jnp.sqrt(jnp.maximum(var, eps))
    w_now, r_now, b_now = weight_df[W - 1:], ret[W - 1:], benchmark[W - 1:, 0]
    w_scaled = w_now * (sigma_scale / (sigma + eps))
    w_prev = jnp.concatenate(
        [jnp.zeros((1, N), jnp.float32), w_scaled[:-1]], axis=0)
    ret_df = (jnp.sum(w_prev * r_now, axis=1)
              - cost * jnp.sum(jnp.abs(w_scaled - w_prev), axis=1))
    mean_r = ret_df.mean()
    std_r = jnp.std(ret_df, ddof=1)
    rc = ret_df - mean_r
    bc = b_now - b_now.mean()
    corr = jnp.abs(jnp.sum(rc * bc)) / jnp.sqrt(
        jnp.sum(rc * rc) * jnp.sum(bc * bc) + eps)
    return -mean_r / std_r + corr_cost * corr


if __name__ == "__main__":
    # Module hyper-parameters (deterministic, set in-script).
    num_asset = 4
    T = 64
    window_size = 21
    span = 63
    cost = 1e-3
    corr_cost = 0.5
    sigma_scale = 0.15

    key = jax.random.PRNGKey(0)
    k_p, k_w, k_b = jax.random.split(key, 3)

    # Synthetic positive price paths, portfolio weights, and benchmark returns.
    log_steps = 0.01 * jax.random.normal(k_p, (T, num_asset), dtype=jnp.float32)
    price = 100.0 * jnp.exp(jnp.cumsum(log_steps, axis=0))            # (T, N)
    weight_df = jax.nn.softmax(
        jax.random.normal(k_w, (T, num_asset), dtype=jnp.float32), axis=1)
    benchmark = 0.005 * jax.random.normal(k_b, (T, 1), dtype=jnp.float32)

    loss = return_loss_pallas(price, weight_df, benchmark,
                              window_size=window_size, cost=cost,
                              sigma_scale=sigma_scale, corr_cost=corr_cost)
    loss = jax.block_until_ready(loss)

    loss_ref = return_loss_ref(price, weight_df, benchmark,
                               window_size=window_size, cost=cost,
                               sigma_scale=sigma_scale, corr_cost=corr_cost)
    loss_ref = jax.block_until_ready(loss_ref)

    assert np.isfinite(float(loss)), f"non-finite loss: {loss}"
    # Exact roll-based shifts + HIGHEST-precision rolling sums -> tight match.
    assert np.allclose(float(loss), float(loss_ref), rtol=1e-2, atol=1e-3), (
        f"pallas={float(loss)} ref={float(loss_ref)}")
    print("KERNEL_OK")
</pallas_src>

<mosaic_0001>
module attributes {stable_mosaic.version = 11 : i64} {
  func.func @_return_loss_kernel(%arg0: memref<64x4xf32, #tpu.memory_space<vmem>>, %arg1: memref<64x4xf32, #tpu.memory_space<vmem>>, %arg2: memref<64x1xf32, #tpu.memory_space<vmem>>, %arg3: memref<64x64xf32, #tpu.memory_space<vmem>>, %arg4: memref<1x1xf32, #tpu.memory_space<vmem>>) attributes {dimension_semantics = [], scalar_prefetch = 0 : i64, scratch_operands = 0 : i64, tpu.core_type = #tpu.core_type<tc>} {
    %c0 = arith.constant 0 : index
    %c0_0 = arith.constant 0 : index
    %0 = vector.load %arg0[%c0, %c0_0] : memref<64x4xf32, #tpu.memory_space<vmem>>, vector<64x4xf32>
    %c0_1 = arith.constant 0 : index
    %c0_2 = arith.constant 0 : index
    %1 = vector.load %arg1[%c0_1, %c0_2] : memref<64x4xf32, #tpu.memory_space<vmem>>, vector<64x4xf32>
    %c0_3 = arith.constant 0 : index
    %c0_4 = arith.constant 0 : index
    %2 = vector.load %arg2[%c0_3, %c0_4] : memref<64x1xf32, #tpu.memory_space<vmem>>, vector<64x1xf32>
    %c0_5 = arith.constant 0 : index
    %c0_6 = arith.constant 0 : index
    %3 = vector.load %arg3[%c0_5, %c0_6] : memref<64x64xf32, #tpu.memory_space<vmem>>, vector<64x64xf32>
    %4 = tpu.iota {dimensions = array<i32: 0>} : vector<64x1xi32>
    %c20_i32 = arith.constant 20 : i32
    %5 = vector.broadcast %c20_i32 : i32 to vector<64x1xi32>
    %6 = arith.cmpi sge, %4, %5 : vector<64x1xi32>
    %7 = arith.extui %6 : vector<64x1xi1> to vector<64x1xi32>
    %8 = arith.sitofp %7 : vector<64x1xi32> to vector<64x1xf32>
    %c1_i32 = arith.constant 1 : i32
    %9 = tpu.dynamic_rotate %0 by %c1_i32 dim 0 : vector<64x4xf32>, i32 -> vector<64x4xf32>
    %cst = arith.constant 0.000000e+00 : f32
    %10 = vector.broadcast %cst : f32 to vector<64x4xf32>
    %11 = arith.cmpf ogt, %9, %10 : vector<64x4xf32>
    %cst_7 = arith.constant 1.000000e+00 : f32
    %12 = vector.broadcast %cst_7 : f32 to vector<64x4xf32>
    %13 = arith.select %11, %9, %12 : vector<64x4xi1>, vector<64x4xf32>
    %c0_i32 = arith.constant 0 : i32
    %14 = vector.broadcast %c0_i32 : i32 to vector<64x1xi32>
    %15 = arith.cmpi sgt, %4, %14 : vector<64x1xi32>
    %cst_8 = arith.constant 0.000000e+00 : f32
    %16 = vector.broadcast %cst_8 : f32 to vector<64x4xf32>
    %17 = arith.cmpf ogt, %9, %16 : vector<64x4xf32>
    %18 = vector.broadcast %15 : vector<64x1xi1> to vector<64x4xi1>
    %19 = arith.andi %18, %17 : vector<64x4xi1>
    %20 = arith.divf %0, %13 : vector<64x4xf32>
    %cst_9 = arith.constant 1.000000e+00 : f32
    %21 = vector.broadcast %cst_9 : f32 to vector<64x4xf32>
    %22 = arith.subf %20, %21 : vector<64x4xf32>
    %cst_10 = arith.constant 0.000000e+00 : f32
    %23 = vector.broadcast %cst_10 : f32 to vector<64x4xf32>
    %24 = arith.select %19, %22, %23 : vector<64x4xi1>, vector<64x4xf32>
    %25 = arith.mulf %24, %24 : vector<64x4xf32>
    %26 = tpu.concatenate %24, %25 in 1 : vector<64x4xf32>, vector<64x4xf32> -> vector<64x8xf32>
    %cst_11 = arith.constant dense<0.000000e+00> : vector<64x8xf32>
    %27 = tpu.matmul %3, %26, %cst_11 {dimension_numbers = #tpu.dot_dimension_numbers<[1], [0], [0], [1], [0, 0, 1, 1], [], []>, precision = #tpu.contract_precision<fp32>} : vector<64x64xf32>, vector<64x8xf32>, vector<64x8xf32> -> vector<64x8xf32>
    %28 = vector.extract_strided_slice %27 {offsets = [0, 0], sizes = [64, 4], strides = [1, 1]} : vector<64x8xf32> to vector<64x4xf32>
    %29 = vector.extract_strided_slice %27 {offsets = [0, 4], sizes = [64, 4], strides = [1, 1]} : vector<64x8xf32> to vector<64x4xf32>
    %30 = arith.mulf %28, %28 : vector<64x4xf32>
    %cst_12 = arith.constant 2.100000e+01 : f32
    %31 = vector.broadcast %cst_12 : f32 to vector<64x4xf32>
    %32 = arith.divf %30, %31 : vector<64x4xf32>
    %33 = arith.subf %29, %32 : vector<64x4xf32>
    %cst_13 = arith.constant 2.000000e+01 : f32
    %34 = vector.broadcast %cst_13 : f32 to vector<64x4xf32>
    %35 = arith.divf %33, %34 : vector<64x4xf32>
    %cst_14 = arith.constant 9.99999996E-13 : f32
    %36 = vector.broadcast %cst_14 : f32 to vector<64x4xf32>
    %37 = arith.maximumf %35, %36 : vector<64x4xf32>
    %38 = math.sqrt %37 : vector<64x4xf32>
    %cst_15 = arith.constant 0.000000e+00 : f32
    %39 = vector.broadcast %cst_15 : f32 to vector<64x1xf32>
    %40 = arith.cmpf ogt, %8, %39 : vector<64x1xf32>
    %cst_16 = arith.constant 9.99999996E-13 : f32
    %41 = vector.broadcast %cst_16 : f32 to vector<64x4xf32>
    %42 = arith.addf %38, %41 : vector<64x4xf32>
    %cst_17 = arith.constant 1.500000e-01 : f32
    %43 = vector.broadcast %cst_17 : f32 to vector<64x4xf32>
    %44 = arith.divf %43, %42 : vector<64x4xf32>
    %45 = arith.mulf %1, %44 : vector<64x4xf32>
    %cst_18 = arith.constant 0.000000e+00 : f32
    %46 = vector.shape_cast %40 : vector<64x1xi1> to vector<64x1xi1>
    %47 = vector.broadcast %46 : vector<64x1xi1> to vector<64x4xi1>
    %48 = vector.broadcast %cst_18 : f32 to vector<64x4xf32>
    %49 = arith.select %47, %45, %48 : vector<64x4xi1>, vector<64x4xf32>
    %c1_i32_19 = arith.constant 1 : i32
    %50 = tpu.dynamic_rotate %49 by %c1_i32_19 dim 0 : vector<64x4xf32>, i32 -> vector<64x4xf32>
    %51 = arith.mulf %50, %24 : vector<64x4xf32>
    %cst_20 = arith.constant dense<0.000000e+00> : vector<64xf32>
    %52 = vector.multi_reduction <add>, %51, %cst_20 [1] : vector<64x4xf32> to vector<64xf32>
    %53 = vector.shape_cast %52 : vector<64xf32> to vector<64x1xf32>
    %54 = arith.subf %49, %50 : vector<64x4xf32>
    %55 = math.absf %54 : vector<64x4xf32>
    %cst_21 = arith.constant dense<0.000000e+00> : vector<64xf32>
    %56 = vector.multi_reduction <add>, %55, %cst_21 [1] : vector<64x4xf32> to vector<64xf32>
    %57 = vector.shape_cast %56 : vector<64xf32> to vector<64x1xf32>
    %cst_22 = arith.constant 1.000000e-03 : f32
    %58 = vector.broadcast %cst_22 : f32 to vector<64x1xf32>
    %59 = arith.mulf %58, %57 : vector<64x1xf32>
    %60 = arith.subf %53, %59 : vector<64x1xf32>
    %61 = arith.mulf %60, %8 : vector<64x1xf32>
    %62 = vector.shape_cast %61 : vector<64x1xf32> to vector<1x64x1xf32>
    %cst_23 = arith.constant dense<0.000000e+00> : vector<1xf32>
    %63 = vector.multi_reduction <add>, %62, %cst_23 [1, 2] : vector<1x64x1xf32> to vector<1xf32>
    %64 = vector.shape_cast %63 : vector<1xf32> to vector<1x1x1xf32>
    %65 = vector.extract %64[0, 0, 0] : f32 from vector<1x1x1xf32>
    %66 = vector.broadcast %65 : f32 to vector<1x1xf32>
    %cst_24 = arith.constant 4.400000e+01 : f32
    %67 = vector.broadcast %cst_24 : f32 to vector<1x1xf32>
    %68 = arith.divf %66, %67 : vector<1x1xf32>
    %69 = vector.broadcast %68 : vector<1x1xf32> to vector<64x1xf32>
    %70 = arith.subf %61, %69 : vector<64x1xf32>
    %71 = arith.mulf %70, %8 : vector<64x1xf32>
    %72 = arith.mulf %71, %71 : vector<64x1xf32>
    %73 = vector.shape_cast %72 : vector<64x1xf32> to vector<1x64x1xf32>
    %cst_25 = arith.constant dense<0.000000e+00> : vector<1xf32>
    %74 = vector.multi_reduction <add>, %73, %cst_25 [1, 2] : vector<1x64x1xf32> to vector<1xf32>
    %75 = vector.shape_cast %74 : vector<1xf32> to vector<1x1x1xf32>
    %76 = vector.extract %75[0, 0, 0] : f32 from vector<1x1x1xf32>
    %77 = vector.broadcast %76 : f32 to vector<1x1xf32>
    %cst_26 = arith.constant 4.300000e+01 : f32
    %78 = vector.broadcast %cst_26 : f32 to vector<1x1xf32>
    %79 = arith.divf %77, %78 : vector<1x1xf32>
    %80 = math.sqrt %79 : vector<1x1xf32>
    %81 = arith.mulf %2, %8 : vector<64x1xf32>
    %82 = vector.shape_cast %81 : vector<64x1xf32> to vector<1x64x1xf32>
    %cst_27 = arith.constant dense<0.000000e+00> : vector<1xf32>
    %83 = vector.multi_reduction <add>, %82, %cst_27 [1, 2] : vector<1x64x1xf32> to vector<1xf32>
    %84 = vector.shape_cast %83 : vector<1xf32> to vector<1x1x1xf32>
    %85 = vector.extract %84[0, 0, 0] : f32 from vector<1x1x1xf32>
    %86 = vector.broadcast %85 : f32 to vector<1x1xf32>
    %cst_28 = arith.constant 4.400000e+01 : f32
    %87 = vector.broadcast %cst_28 : f32 to vector<1x1xf32>
    %88 = arith.divf %86, %87 : vector<1x1xf32>
    %89 = vector.broadcast %88 : vector<1x1xf32> to vector<64x1xf32>
    %90 = arith.subf %2, %89 : vector<64x1xf32>
    %91 = arith.mulf %90, %8 : vector<64x1xf32>
    %92 = arith.mulf %71, %91 : vector<64x1xf32>
    %93 = vector.shape_cast %92 : vector<64x1xf32> to vector<1x64x1xf32>
    %cst_29 = arith.constant dense<0.000000e+00> : vector<1xf32>
    %94 = vector.multi_reduction <add>, %93, %cst_29 [1, 2] : vector<1x64x1xf32> to vector<1xf32>
    %95 = vector.shape_cast %94 : vector<1xf32> to vector<1x1x1xf32>
    %96 = vector.extract %95[0, 0, 0] : f32 from vector<1x1x1xf32>
    %97 = vector.broadcast %96 : f32 to vector<1x1xf32>
    %98 = math.absf %97 : vector<1x1xf32>
    %99 = arith.mulf %91, %91 : vector<64x1xf32>
    %100 = vector.shape_cast %99 : vector<64x1xf32> to vector<1x64x1xf32>
    %cst_30 = arith.constant dense<0.000000e+00> : vector<1xf32>
    %101 = vector.multi_reduction <add>, %100, %cst_30 [1, 2] : vector<1x64x1xf32> to vector<1xf32>
    %102 = vector.shape_cast %101 : vector<1xf32> to vector<1x1x1xf32>
    %103 = vector.extract %102[0, 0, 0] : f32 from vector<1x1x1xf32>
    %104 = vector.broadcast %103 : f32 to vector<1x1xf32>
    %105 = arith.mulf %77, %104 : vector<1x1xf32>
    %cst_31 = arith.constant 9.99999996E-13 : f32
    %106 = vector.broadcast %cst_31 : f32 to vector<1x1xf32>
    %107 = arith.addf %105, %106 : vector<1x1xf32>
    %108 = math.sqrt %107 : vector<1x1xf32>
    %109 = arith.divf %98, %108 : vector<1x1xf32>
    %cst_32 = arith.constant 0.000000e+00 : f32
    %110 = vector.broadcast %cst_32 : f32 to vector<1x1xf32>
    %111 = arith.subf %110, %68 : vector<1x1xf32>
    %112 = arith.divf %111, %80 : vector<1x1xf32>
    %cst_33 = arith.constant 5.000000e-01 : f32
    %113 = vector.broadcast %cst_33 : f32 to vector<1x1xf32>
    %114 = arith.mulf %113, %109 : vector<1x1xf32>
    %115 = arith.addf %112, %114 : vector<1x1xf32>
    %c0_34 = arith.constant 0 : index
    %c0_35 = arith.constant 0 : index
    %116 = vector.load %arg4[%c0_34, %c0_35] : memref<1x1xf32, #tpu.memory_space<vmem>>, vector<1x1xf32>
    tpu.vector_store %arg4[%c0_34, %c0_35], %115 {strides = array<i32>} : memref<1x1xf32, #tpu.memory_space<vmem>>, vector<1x1xf32>,
    return
  }
}

</mosaic_0001>

<bundles_post_ra>
// kernel: tpu_custom_call.1
= control target key start
LH: loop header
LB: loop body
LE: loop exit
PB: predicated region body
PF: predicated region fallthrough
CT: control target
= control target key end

     0   :  { %v50_v2 = vlaneseq  ;;  %s2789_s0 = inlined_call_operand.vmem [shape: f32[64,4], index: 0, kind: input, shape index: {}]   ;;  %s2790_s1 = inlined_call_operand.vmem [shape: f32[64,4], index: 1, kind: input, shape index: {}]   ;;  %s2791_s2 = inlined_call_operand.vmem [shape: f32[64,1], index: 2, kind: input, shape index: {}]   ;;  %s2792_s3 = inlined_call_operand.vmem [shape: f32[64,64], index: 3, kind: input, shape index: {}]   ;;  %s2793_s4 = inlined_call_operand.hbm [shape: f32[1,1], index: 4, kind: output, shape index: {}]  }
   0x1   :  { %v2182_v0 = vld [vmem:[%s2789_s0 + $0x8] sm:$0xff]  ;;  %v20_v1 = vld [vmem:[%s2789_s0 + $0x10] sm:$0xff]  ;;  %v18_v3 = vld [vmem:[%s2789_s0] sm:$0xff] }
   0x2   :  { %v84_v4 = vrot.slane %v2182_v0, 7  ;;  %v85_v5 = vrot.slane %v20_v1, 7  ;;  %v2194_v6 = vld [vmem:[%s2789_s0 + $0x38] sm:$0xff]  ;;  %v83_v7 = vrot.slane %v18_v3, 7  ;;  %v2202_v9 = vld [vmem:[%s2789_s0 + $0x20] sm:$0xff]  ;;  %v2204_v10 = vshrl.u32 %v50_v2, 7 }
   0x3   :  { %v21_v8 = vld [vmem:[%s2789_s0 + $0x18] sm:$0xff]  ;;  %v90_v11 = vrot.slane %v2194_v6, 7  ;;  %v23_v13 = vld [vmem:[%s2789_s0 + $0x28] sm:$0xff]  ;;  %v2213_v14 = vld [vmem:[%s2789_s0 + $0x30] sm:$0xff] }
   0x4   :  { %v86_v12 = vrot.slane %v21_v8, 7 }
   0x5   :  { %9 = vsyncpa [#allocation3], 0  ;;  %vm91_vm0 = vcmp.lt.s32.totalorder %v2204_v10, 1  ;;  %v87_v15 = vrot.slane %v2202_v9, 7  ;;  %v88_v16 = vrot.slane %v23_v13, 7  ;;  %v89_v17 = vrot.slane %v2213_v14, 7 }
   0x6   :  { %v97_v18 = vsel %vm91_vm0, %v84_v4, %v85_v5  ;;  %v99_v19 = vsel %vm91_vm0, %v90_v11, %v83_v7  ;;  %v96_v20 = vsel %vm91_vm0, %v85_v5, %v86_v12  ;;  %v98_v21 = vsel %vm91_vm0, %v83_v7, %v84_v4  ;;  %s2150_s0 = smov 4   ;;  %v42_v4 = vld [vmem:[%s2792_s3] sm:$0xff]  ;;  %s2153_s24 = smov [#allocation2]  }
   0x7   :  { %vm102_vm1 = vcmp.gt.f32.partialorder %v97_v18, 0.0  ;;  %vm100_vm2 = vcmp.gt.f32.partialorder %v99_v19, 0.0  ;;  %vm103_vm3 = vcmp.gt.f32.partialorder %v96_v20, 0.0  ;;  %vm101_vm4 = vcmp.gt.f32.partialorder %v98_v21, 0.0  ;;  %s1657_s25 = sshll.u32 %s2153_s24, 4  ;;  %s1658_s25 = int_to_ptr.vmem [resolvable:$true] %s1657_s25 }
   0x8   :  { %v110_v22 = vsel %vm102_vm1, %v97_v18, 1.0  ;;  %v108_v23 = vsel %vm100_vm2, %v99_v19, 1.0  ;;  %v111_v24 = vsel %vm103_vm3, %v96_v20, 1.0  ;;  %v109_v25 = vsel %vm101_vm4, %v98_v21, 1.0  ;;  %v43_v18 = vld [vmem:[%s2792_s3 + $0x8] sm:$0xff]  ;;  %s2126_s26 = scalar_lea.vmem %s1658_s25, 16  ;;  %p2131_p1 = scmp.lt.s32.totalorder %s1658_s25, %s1658_s25 }
   0x9   :  { %2078 = vrcp.f32 %v110_v22  ;;  %v94_v26 = vsel %vm91_vm0, %v87_v15, %v88_v16  ;;  %v95_v27 = vsel %vm91_vm0, %v86_v12, %v87_v15  ;;  %v2236_v28 = vsel %vm91_vm0, %v89_v17, %v90_v11  ;;  %v44_v22 = vld [vmem:[%s2792_s3 + $0x10] sm:$0xff]  ;;  %p2127_p0 = scmp.ne.s32.totalorder %s1658_s25, %s2126_s26  ;;  %s2130_s27 = scalar_lea.vmem %s1658_s25, 32 }
   0xa   :  { %2080 = vrcp.f32 %v108_v23  ;;  %vm105_vm5 = vcmp.gt.f32.partialorder %v94_v26, 0.0  ;;  %vm104_vm6 = vcmp.gt.f32.partialorder %v95_v27, 0.0  ;;  %vm107_vm7 = vcmp.gt.f32.partialorder %v2236_v28, 0.0  ;;  %p2132_p2 = scmp.lt.s32.totalorder %s2130_s27, %s2126_s26 }
   0xb   :  { %2082 = vrcp.f32 %v111_v24  ;;  %v113_v29 = vsel %vm105_vm5, %v94_v26, 1.0  ;;  %v112_v30 = vsel %vm104_vm6, %v95_v27, 1.0  ;;  %v115_v31 = vsel %vm107_vm7, %v2236_v28, 1.0 }
   0xc   :  { %2084 = vrcp.f32 %v109_v25  ;;  %v93_v32 = vsel %vm91_vm0, %v88_v16, %v89_v17  ;;  %vm116_vm9 = vcmp.gt.s32.totalorder %v2204_v10, 0  ;;  %vm229_vm11 = vcmask 523264   ;;  %v45_v25 = vld [vmem:[%s2792_s3 + $0x18] sm:$0xff]  ;;  %p2133_p3 = por %p2132_p2, %p2131_p1 }
   0xd   :  { %2086 = vrcp.f32 %v113_v29  ;;  %vm106_vm8 = vcmp.gt.f32.partialorder %v93_v32, 0.0  ;;  %vm140_vm10 = vmand %vm116_vm9, %vm100_vm2  ;;  %v231_v5 = vsel %vm229_vm11, %v42_v4, 0  ;;  %v234_v19 = vsel %vm229_vm11, %v43_v18, 0 }
   0xe   :  { %2088 = vrcp.f32 %v112_v30  ;;  %v114_v33 = vsel %vm106_vm8, %v93_v32, 1.0  ;;  %v2287_v7 = vand.u32 4294901760, %v231_v5  ;;  %vm220_vm12 = vcmask 31744   ;;  %p2134_p4 = pnand %p2133_p3, %p2127_p0 }
   0xf   :  { %2090 = vrcp.f32 %v115_v31  ;;  %v2316_v20 = vand.u32 4294901760, %v234_v19  ;;  %v237_v27 = vsel %vm229_vm11, %v44_v22, 0 }
  0x10   :  { %2092 = vrcp.f32 %v114_v33  ;;  %v2300_v12 = vsub.f32 %v231_v5, %v2287_v7  ;;  %v240_v33 = vsel %vm229_vm11, %v45_v25, 0 }
  0x11   :  { %v2327_v26 = vsub.f32 %v234_v19, %v2316_v20 }
  0x13   :  { %v2079_v34 = vpop.eup %2078 }
  0x14   :  { %v2081_v35 = vpop.eup %2080  ;;  %v153_v36 = vmul.f32 %v2079_v34, %v20_v1  ;;  %v46_v34 = vld [vmem:[%s2792_s3 + $0x20] sm:$0xff] }
  0x15   :  { %v2083_v37 = vpop.eup %2082  ;;  %v149_v38 = vmul.f32 %v2081_v35, %v18_v3  ;;  %v47_v35 = vld [vmem:[%s2792_s3 + $0x28] sm:$0xff] }
  0x16   :  { %v2085_v39 = vpop.eup %2084  ;;  %v1668_v40 = vadd.f32 -1.0, %v153_v36  ;;  %v155_v41 = vmul.f32 %v2083_v37, %v21_v8 }
  0x17   :  { %v2087_v42 = vpop.eup %2086  ;;  %v1666_v43 = vadd.f32 -1.0, %v149_v38  ;;  %v151_v44 = vmul.f32 %v2085_v39, %v2182_v0  ;;  %v2343_v38 = vand.u32 4294901760, %v237_v27 }
  0x18   :  { %v2089_v45 = vpop.eup %2088  ;;  %v2251_v46 = vsel %vm102_vm1, %v1668_v40, 0.0  ;;  %v1669_v47 = vadd.f32 -1.0, %v155_v41  ;;  %v159_v48 = vmul.f32 %v2087_v42, %v23_v13  ;;  %v2795_v40 = vand.u32 4294901760, %v2327_v26 }
  0x19   :  { %v2091_v49 = vpop.eup %2090  ;;  %v182_v50 = vmul.f32 %v2251_v46, %v2251_v46  ;;  %v2255_v51 = vsel %vm140_vm10, %v1666_v43, 0.0  ;;  %v1667_v52 = vadd.f32 -1.0, %v151_v44  ;;  %v157_v53 = vmul.f32 %v2089_v45, %v2202_v9 }
  0x1a   :  { %v2093_v54 = vpop.eup %2092  ;;  %v180_v55 = vmul.f32 %v2255_v51, %v2255_v51  ;;  %v2261_v56 = vsel %vm103_vm3, %v1669_v47, 0.0  ;;  %v1671_v57 = vadd.f32 -1.0, %v159_v48  ;;  %v163_v58 = vmul.f32 %v2091_v49, %v2194_v6 }
  0x1b   :  { %200 = vrot.lane.b32.xlu1 %v182_v50, %s2150_s0  ;;  %v183_v59 = vmul.f32 %v2261_v56, %v2261_v56  ;;  %v2268_v60 = vsel %vm101_vm4, %v1667_v52, 0.0  ;;  %v1670_v61 = vadd.f32 -1.0, %v157_v53  ;;  %v161_v62 = vmul.f32 %v2093_v54, %v2213_v14 }
  0x1c   :  { %196 = vrot.lane.b32.xlu0 %v180_v55, %s2150_s0  ;;  %v181_v63 = vmul.f32 %v2268_v60, %v2268_v60  ;;  %v2275_v0 = vsel %vm105_vm5, %v1671_v57, 0.0  ;;  %v1673_v1 = vadd.f32 -1.0, %v163_v58  ;;  %v329_v14 = vand.u32 4294901760, %v2300_v12  ;;  %v48_v58 = vld [vmem:[%s2792_s3 + $0x30] sm:$0xff] }
  0x1d   :  { %2799 = vst [vmem:[#allocation5_spill] sm:$0xff] %v2275_v0  ;;  %v2278_v2 = vsel %vm104_vm6, %v1670_v61, 0.0  ;;  %v1672_v3 = vadd.f32 -1.0, %v161_v62  ;;  %v185_v6 = vmul.f32 %v2275_v0, %v2275_v0  ;;  %v2346_v43 = vand.u32 4294901760, %v240_v33 }
  0x1e   :  { %v184_v8 = vmul.f32 %v2278_v2, %v2278_v2  ;;  %v2294_v9 = vsel %vm107_vm7, %v1673_v1, 0.0  ;;  %v330_v16 = vsub.f32 %v2300_v12, %v329_v14  ;;  %1870 = vmatprep.mubr.f32.mxu0 %v329_v14  ;;  %v243_v44 = vsel %vm229_vm11, %v46_v34, 0  ;;  %v49_v1 = vld [vmem:[%s2792_s3 + $0x38] sm:$0xff]  ;;  %s2151_s3 = smov 124  }
  0x1f   :  { %202 = vrot.lane.b32.xlu1 %v183_v59, %s2150_s0  ;;  %2800 = vst [vmem:[#allocation6_spill] sm:$0xff] %v2294_v9  ;;  %v2297_v11 = vsel %vm106_vm8, %v1672_v3, 0.0  ;;  %v187_v13 = vmul.f32 %v2294_v9, %v2294_v9  ;;  %v246_v45 = vsel %vm229_vm11, %v47_v35, 0  ;;  %v2363_v57 = vsub.f32 %v237_v27, %v2343_v38 }
  0x20   :  { %198 = vrot.lane.b32.xlu0 %v181_v63, %s2150_s0  ;;  %2801 = vst [vmem:[#allocation7_spill] sm:$0xff] %v2297_v11  ;;  %v186_v15 = vmul.f32 %v2297_v11, %v2297_v11  ;;  %v331_v17 = vand.u32 4294901760, %v330_v16  ;;  %v2376_v63 = vsub.f32 %v2327_v26, %v2795_v40  ;;  %v2386_v5 = vsub.f32 %v240_v33, %v2346_v43 }
  0x21   :  { %v252_v22 = vsel %vm229_vm11, %v49_v1, 0 }
  0x22   :  { %1786 = vmatprep.mubr.f32.mxu1 %v331_v17  ;;  %v249_v17 = vsel %vm229_vm11, %v48_v58, 0 }
  0x23   :  { %206 = vrot.lane.b32.xlu1 %v185_v6, %s2150_s0  ;;  %v2388_v6 = vand.u32 4294901760, %v243_v44  ;;  %v2425_v35 = vand.u32 4294901760, %v249_v17 }
  0x24   :  { %204 = vrot.lane.b32.xlu0 %v184_v8, %s2150_s0  ;;  %v2390_v8 = vand.u32 4294901760, %v246_v45 }
  0x26   :  { %v2423_v34 = vsub.f32 %v246_v45, %v2390_v8  ;;  %v341_v45 = vand.u32 4294901760, %v2376_v63 }
  0x27   :  { %210 = vrot.lane.b32.xlu1 %v187_v13, %s2150_s0 }
  0x28   :  { %208 = vrot.lane.b32.xlu0 %v186_v15, %s2150_s0  ;;  %v379_v1 = vand.u32 4294901760, %v2423_v34 }
  0x8d   :  { %v201_v21 = vpop.permute.xlu1 %200 }
  0x8e   :  { %v197_v23 = vpop.permute.xlu0 %196  ;;  %v223_v29 = vsel %vm220_vm12, %v2251_v46, %v201_v21 }
  0x8f   :  { %v221_v24 = vsel %vm220_vm12, %v2255_v51, %v197_v23  ;;  %v261_v41 = vand.u32 4294901760, %v223_v29 }
  0x90   :  { %v255_v30 = vand.u32 4294901760, %v221_v24 }
  0x91   :  { %v203_v28 = vpop.permute.xlu1 %202  ;;  %v2381_v3 = vsub.f32 %v223_v29, %v261_v41  ;;  %v349_v29 = vand.u32 4294901760, %v2363_v57 }
  0x92   :  { %v224_v31 = vsel %vm220_vm12, %v2261_v56, %v203_v28  ;;  %v199_v32 = vpop.permute.xlu0 %198  ;;  %v2350_v47 = vsub.f32 %v221_v24, %v255_v30 }
  0x93   :  { %v264_v36 = vand.u32 4294901760, %v224_v31  ;;  %v222_v37 = vsel %vm220_vm12, %v2268_v60, %v199_v32  ;;  %v424_v28 = vand.u32 4294901760, %v2381_v3 }
  0x94   :  { %v258_v39 = vand.u32 4294901760, %v222_v37  ;;  %v410_v13 = vand.u32 4294901760, %v2350_v47 }
  0x95   :  { %v207_v42 = vpop.permute.xlu1 %206  ;;  %v2358_v53 = vsub.f32 %v224_v31, %v264_v36  ;;  %v2368_v59 = vpack.c.bf16 %v264_v36, %v261_v41  ;;  %v2415_v31 = vsub.f32 %v243_v44, %v2388_v6 }
  0x96   :  { %v2352_v48 = vpack.c.bf16 %v258_v39, %v255_v30  ;;  %v2354_v49 = vsub.f32 %v222_v37, %v258_v39  ;;  %v226_v50 = vsel %vm220_vm12, %v2275_v0, %v207_v42  ;;  %v205_v52 = vpop.permute.xlu0 %204  ;;  %v2794_v30 = vand.u32 4294901760, %v2386_v5 }
  0x97   :  { %v270_v54 = vand.u32 4294901760, %v226_v50  ;;  %v225_v55 = vsel %vm220_vm12, %v2278_v2, %v205_v52  ;;  %v431_v18 = vand.u32 4294901760, %v2358_v53  ;;  %v411_v33 = vsub.f32 %v2350_v47, %v410_v13 }
  0x98   :  { %v417_v61 = vand.u32 4294901760, %v2354_v49  ;;  %v267_v62 = vand.u32 4294901760, %v225_v55  ;;  %1939 = vmatprep.subr.bf16.mxu1 %v2352_v48  ;;  %1987 = vmatprep.subr.bf16.mxu0 %v2352_v48  ;;  %v2429_v39 = vand.u32 4294901760, %v252_v22  ;;  %v425_v52 = vsub.f32 %v2381_v3, %v424_v28 }
  0x99   :  { %1941 = vmatpush3.bf16.msra.mxu1 %v2352_v48  ;;  %1989 = vmatpush3.bf16.msra.mxu0 %v2352_v48  ;;  %v211_v4 = vpop.permute.xlu1 %210  ;;  %v2401_v19 = vsub.f32 %v226_v50, %v270_v54  ;;  %v432_v37 = vsub.f32 %v2358_v53, %v431_v18  ;;  %v412_v58 = vand.u32 4294901760, %v411_v33  ;;  %v2006_v40 = vpack.c.bf16 %v431_v18, %v424_v28 }
  0x9a   :  { %v2393_v14 = vpack.c.bf16 %v270_v54, %v267_v62  ;;  %v228_v15 = vsel %vm220_vm12, %v2294_v9, %v211_v4  ;;  %1943 = vmatprep.subr.bf16.mxu1 %v2368_v59  ;;  %1991 = vmatprep.subr.bf16.mxu0 %v2368_v59  ;;  %v209_v16 = vpop.permute.xlu0 %208  ;;  %v2406_v23 = vsub.f32 %v225_v55, %v267_v62  ;;  %v369_v62 = vand.u32 4294901760, %v2415_v31 }
  0x9b   :  { %v227_v21 = vsel %vm220_vm12, %v2297_v11, %v209_v16  ;;  %v276_v24 = vand.u32 4294901760, %v228_v15  ;;  %v418_v27 = vsub.f32 %v2354_v49, %v417_v61  ;;  %v445_v36 = vand.u32 4294901760, %v2401_v19 }
  0x9c   :  { %v273_v25 = vand.u32 4294901760, %v227_v21  ;;  %v438_v41 = vand.u32 4294901760, %v2406_v23  ;;  %v350_v54 = vsub.f32 %v2363_v57, %v349_v29  ;;  %v360_v55 = vsub.f32 %v2386_v5, %v2794_v30 }
  0x9d   :  { %1945 = vmatpush3.bf16.msra.mxu1 %v2368_v59  ;;  %1993 = vmatpush3.bf16.msra.mxu0 %v2368_v59  ;;  %v2432_v42 = vsub.f32 %v228_v15, %v276_v24  ;;  %v419_v50 = vand.u32 4294901760, %v418_v27  ;;  %v2449_v4 = vsub.f32 %v249_v17, %v2425_v35  ;;  %v2002_v63 = vpack.c.bf16 %v417_v61, %v410_v13 }
  0x9e   :  { %v2417_v32 = vpack.c.bf16 %v276_v24, %v273_v25  ;;  %1947 = vmatprep.subr.bf16.mxu1 %v2393_v14  ;;  %1995 = vmatprep.subr.bf16.mxu0 %v2393_v14  ;;  %v2434_v44 = vsub.f32 %v227_v21, %v273_v25  ;;  %v433_v15 = vand.u32 4294901760, %v432_v37  ;;  %v446_v16 = vsub.f32 %v2401_v19, %v445_v36 }
  0x9f   :  { %v2453_v21 = vsub.f32 %v252_v22, %v2429_v39  ;;  %v459_v24 = vand.u32 4294901760, %v2432_v42  ;;  %v1954_v27 = vpack.c.bf16 %v419_v50, %v412_v58  ;;  %v439_v33 = vsub.f32 %v2406_v23, %v438_v41 }
  0xa0   :  { %v452_v25 = vand.u32 4294901760, %v2434_v44  ;;  %v426_v17 = vand.u32 4294901760, %v425_v52  ;;  %v351_v61 = vand.u32 4294901760, %v350_v54  ;;  %v361_v13 = vand.u32 4294901760, %v360_v55 }
  0xa1   :  { %1949 = vmatpush3.bf16.msra.mxu1 %v2393_v14  ;;  %1997 = vmatpush3.bf16.msra.mxu0 %v2393_v14  ;;  %v370_v37 = vsub.f32 %v2415_v31, %v369_v62  ;;  %v380_v22 = vsub.f32 %v2423_v34, %v379_v1  ;;  %v389_v9 = vand.u32 4294901760, %v2449_v4  ;;  %v399_v50 = vand.u32 4294901760, %v2453_v21 }
  0xa2   :  { %1951 = vmatprep.subr.bf16.mxu1 %v2417_v32  ;;  %1999 = vmatprep.subr.bf16.mxu0 %v2417_v32  ;;  %v1958_v30 = vpack.c.bf16 %v433_v15, %v426_v17  ;;  %v2802_v58 = vand.u32 4294901760, %v2327_v26  ;;  %v440_v11 = vand.u32 4294901760, %v439_v33  ;;  %v447_v52 = vand.u32 4294901760, %v446_v16 }
  0xa3   :  { %v453_v0 = vsub.f32 %v2434_v44, %v452_v25  ;;  %v460_v54 = vsub.f32 %v2432_v42, %v459_v24  ;;  %v371_v18 = vand.u32 4294901760, %v370_v37  ;;  %v381_v28 = vand.u32 4294901760, %v380_v22 }
  0xa4   :  { %v390_v55 = vsub.f32 %v2449_v4, %v389_v9  ;;  %v2803_v15 = vand.u32 4294901760, %v2386_v5  ;;  %v1962_v16 = vpack.c.bf16 %v447_v52, %v440_v11  ;;  %v2010_v33 = vpack.c.bf16 %v445_v36, %v438_v41 }
  0xa5   :  { %1953 = vmatpush3.bf16.msra.mxu1 %v2417_v32  ;;  %2001 = vmatpush3.bf16.msra.mxu0 %v2417_v32  ;;  %v454_v17 = vand.u32 4294901760, %v453_v0  ;;  %v1970_v0 = vpack.c.bf16 %v2354_v49, %v2350_v47  ;;  %v1978_v11 = vpack.c.bf16 %v2401_v19, %v2406_v23 }
  0xa6   :  { %1955 = vmatprep.subr.bf16.mxu1 %v1954_v27  ;;  %2003 = vmatprep.subr.bf16.mxu0 %v2002_v63 }
  0xa8   :  { %1787 = vmatmul.mubr.f32.vlgmr.msra.gmra.mrb[0].mxu1 %v341_v45  ;;  %1871 = vmatmul.mubr.f32.vlgmr.msra.gmra.mrb[0].mxu0 %v2802_v58  ;;  %v400_v45 = vsub.f32 %v2453_v21, %v399_v50  ;;  %v461_v58 = vand.u32 4294901760, %v460_v54 }
  0xa9   :  { %1957 = vmatpush3.bf16.msra.mxu1 %v1954_v27  ;;  %2005 = vmatpush3.bf16.msra.mxu0 %v2002_v63  ;;  %v2014_v27 = vpack.c.bf16 %v459_v24, %v452_v25 }
  0xaa   :  { %1959 = vmatprep.subr.bf16.mxu1 %v1958_v30  ;;  %2007 = vmatprep.subr.bf16.mxu0 %v2006_v40  ;;  %v1966_v63 = vpack.c.bf16 %v461_v58, %v454_v17 }
  0xab   :  { %1789 = vmatprep.mubr.f32.mxu1 %v351_v61  ;;  %1873 = vmatprep.mubr.f32.mxu0 %v349_v29  ;;  %v391_v29 = vand.u32 4294901760, %v390_v55  ;;  %v401_v61 = vand.u32 4294901760, %v400_v45 }
  0xac   :  { %1790 = vmatmul.mubr.f32.gmra.mrb[2].mxu1 %v361_v13  ;;  %1874 = vmatmul.mubr.f32.gmra.mrb[2].mxu0 %v2803_v15 }
  0xad   :  { %1961 = vmatpush3.bf16.msra.mxu1 %v1958_v30  ;;  %2009 = vmatpush3.bf16.msra.mxu0 %v2006_v40  ;;  %v1982_v40 = vpack.c.bf16 %v2432_v42, %v2434_v44 }
  0xae   :  { %1963 = vmatprep.subr.bf16.mxu1 %v1962_v16  ;;  %2011 = vmatprep.subr.bf16.mxu0 %v2010_v33 }
  0xaf   :  { %1792 = vmatprep.mubr.f32.mxu1 %v371_v18  ;;  %1876 = vmatprep.mubr.f32.mxu0 %v369_v62 }
  0xb0   :  { %1793 = vmatmul.mubr.f32.gmra.mrb[4].mxu1 %v381_v28  ;;  %1877 = vmatmul.mubr.f32.gmra.mrb[4].mxu0 %v379_v1 }
  0xb1   :  { %1965 = vmatpush3.bf16.msra.mxu1 %v1962_v16  ;;  %2013 = vmatpush3.bf16.msra.mxu0 %v2010_v33 }
  0xb2   :  { %1967 = vmatprep.subr.bf16.mxu1 %v1966_v63  ;;  %2015 = vmatprep.subr.bf16.mxu0 %v2014_v27 }
  0xb3   :  { %1795 = vmatprep.mubr.f32.mxu1 %v391_v29  ;;  %1879 = vmatprep.mubr.f32.mxu0 %v389_v9  ;;  %v1974_v9 = vpack.c.bf16 %v2358_v53, %v2381_v3 }
  0xb4   :  { %1796 = vmatmul.mubr.f32.gmra.mrb[6].mxu1 %v401_v61  ;;  %1880 = vmatmul.mubr.f32.gmra.mrb[6].mxu0 %v399_v50 }
  0xb5   :  { %1969 = vmatpush3.bf16.msra.mxu1 %v1966_v63  ;;  %2017 = vmatpush3.bf16.msra.mxu0 %v2014_v27 }
  0xb6   :  { %1971 = vmatprep.subr.bf16.mxu1 %v1970_v0  ;;  %2019 = vmatprep.subr.bf16.mxu0 %v2352_v48 }
  0xb7   :  { %1814 = vmatprep.mubr.f32.mxu1 %v2287_v7  ;;  %1898 = vmatprep.mubr.f32.mxu0 %v2287_v7 }
  0xb8   :  { %1815 = vmatmul.mubr.f32.vlgmr.msra.gmra.mrb[8].mxu1 %v2316_v20  ;;  %1899 = vmatmul.mubr.f32.vlgmr.msra.gmra.mrb[8].mxu0 %v2316_v20 }
  0xb9   :  { %1973 = vmatpush3.bf16.msra.mxu1 %v1970_v0  ;;  %2021 = vmatpush3.bf16.msra.mxu0 %v2352_v48 }
  0xba   :  { %1975 = vmatprep.subr.bf16.mxu1 %v1974_v9  ;;  %2023 = vmatprep.subr.bf16.mxu0 %v2368_v59 }
  0xbb   :  { %1817 = vmatprep.mubr.f32.mxu1 %v2343_v38  ;;  %1901 = vmatprep.mubr.f32.mxu0 %v2343_v38 }
  0xbc   :  { %1818 = vmatmul.mubr.f32.gmra.mrb[2].mxu1 %v2346_v43  ;;  %1902 = vmatmul.mubr.f32.gmra.mrb[2].mxu0 %v2346_v43 }
  0xbd   :  { %1977 = vmatpush3.bf16.msra.mxu1 %v1974_v9  ;;  %2025 = vmatpush3.bf16.msra.mxu0 %v2368_v59 }
  0xbe   :  { %1979 = vmatprep.subr.bf16.mxu1 %v1978_v11  ;;  %2027 = vmatprep.subr.bf16.mxu0 %v2393_v14 }
  0xbf   :  { %1820 = vmatprep.mubr.f32.mxu1 %v2388_v6  ;;  %1904 = vmatprep.mubr.f32.mxu0 %v2388_v6 }
  0xc0   :  { %1821 = vmatmul.mubr.f32.gmra.mrb[4].mxu1 %v2390_v8  ;;  %1905 = vmatmul.mubr.f32.gmra.mrb[4].mxu0 %v2390_v8 }
  0xc1   :  { %1981 = vmatpush3.bf16.msra.mxu1 %v1978_v11  ;;  %2029 = vmatpush3.bf16.msra.mxu0 %v2393_v14 }
  0xc2   :  { %1983 = vmatprep.subr.bf16.mxu1 %v1982_v40  ;;  %2031 = vmatprep.subr.bf16.mxu0 %v2417_v32 }
  0xc3   :  { %1823 = vmatprep.mubr.f32.mxu1 %v2425_v35  ;;  %1907 = vmatprep.mubr.f32.mxu0 %v2425_v35 }
  0xc4   :  { %1824 = vmatmul.mubr.f32.gmra.mrb[6].mxu1 %v2429_v39  ;;  %1908 = vmatmul.mubr.f32.gmra.mrb[6].mxu0 %v2429_v39 }
  0xc5   :  { %1985 = vmatpush3.bf16.msra.mxu1 %v1982_v40  ;;  %2033 = vmatpush3.bf16.msra.mxu0 %v2417_v32 }
  0xc6   :  { %1842 = vmatprep.mubr.f32.mxu1 %v2300_v12  ;;  %1926 = vmatprep.mubr.f32.mxu0 %v2287_v7 }
  0xc8   :  { %1843 = vmatmul.mubr.f32.vlgmr.msra.gmra.mrb[10].mxu1 %v2327_v26  ;;  %1927 = vmatmul.mubr.f32.vlgmr.msra.gmra.mrb[10].mxu0 %v2316_v20 }
  0xc9   :  { %1845 = vmatprep.mubr.f32.mxu1 %v2363_v57  ;;  %1929 = vmatprep.mubr.f32.mxu0 %v2343_v38 }
  0xcc   :  { %1846 = vmatmul.mubr.f32.gmra.mrb[2].mxu1 %v2386_v5  ;;  %1930 = vmatmul.mubr.f32.gmra.mrb[2].mxu0 %v2346_v43 }
  0xcd   :  { %1848 = vmatprep.mubr.f32.mxu1 %v2415_v31  ;;  %1932 = vmatprep.mubr.f32.mxu0 %v2388_v6 }
  0xd0   :  { %1849 = vmatmul.mubr.f32.gmra.mrb[4].mxu1 %v2423_v34  ;;  %1933 = vmatmul.mubr.f32.gmra.mrb[4].mxu0 %v2390_v8 }
  0xd1   :  { %1851 = vmatprep.mubr.f32.mxu1 %v2449_v4  ;;  %1935 = vmatprep.mubr.f32.mxu0 %v2425_v35 }
  0xd4   :  { %1852 = vmatmul.mubr.f32.gmra.mrb[6].mxu1 %v2453_v21  ;;  %1936 = vmatmul.mubr.f32.gmra.mrb[6].mxu0 %v2429_v39 }
 0x17b   :  { %v1788_v7 = vpop.f32.mrb[0].mxu1  ;;  %v1872_v12 = vpop.f32.mrb[0].mxu0 }
 0x17c   :  { %v333_v20 = vpop.f32.mrb[1].mxu1  ;;  %v774_v26 = vpop.f32.mrb[1].mxu0 }
 0x18b   :  { %v1816_v38 = vpop.f32.mrb[8].mxu1  ;;  %v1900_v43 = vpop.f32.mrb[8].mxu0 }
 0x18c   :  { %v514_v47 = vpop.f32.mrb[9].mxu1  ;;  %v925_v48 = vpop.f32.mrb[9].mxu0 }
 0x19b   :  { %v1844_v49 = vpop.f32.mrb[10].mxu1  ;;  %v1928_v53 = vpop.f32.mrb[10].mxu0 }
 0x19c   :  { %v644_v57 = vpop.f32.mrb[11].mxu1  ;;  %v1046_v59 = vpop.f32.mrb[11].mxu0 }
 0x19f   :  { %v1847_v3 = vpop.f32.mrb[2].mxu1  ;;  %v1931_v5 = vpop.f32.mrb[2].mxu0 }
 0x1a0   :  { %v2034_v6 = vadd.f32 %v1931_v5, %v1847_v3  ;;  %v658_v8 = vpop.f32.mrb[3].mxu1  ;;  %v1058_v14 = vpop.f32.mrb[3].mxu0 }
 0x1a1   :  { %v2035_v19 = vadd.f32 %v1058_v14, %v658_v8 }
 0x1a2   :  { %v1095_v37 = vmul.f32 %v2034_v6, %v2034_v6 }
 0x1a3   :  { %v1094_v23 = vmul.f32 %v2035_v19, %v2035_v19  ;;  %v1850_v30 = vpop.f32.mrb[4].mxu1  ;;  %v1934_v31 = vpop.f32.mrb[4].mxu0 }
 0x1a4   :  { %v2036_v32 = vadd.f32 %v1934_v31, %v1850_v30  ;;  %v672_v34 = vpop.f32.mrb[5].mxu1  ;;  %v1070_v35 = vpop.f32.mrb[5].mxu0  ;;  %v1104_v52 = vmul.f32 0.04761905, %v1095_v37 }
 0x1a5   :  { %v1103_v36 = vmul.f32 0.04761905, %v1094_v23  ;;  %v2037_v39 = vadd.f32 %v1070_v35, %v672_v34 }
 0x1a6   :  { %v1097_v54 = vmul.f32 %v2036_v32, %v2036_v32 }
 0x1a7   :  { %v1096_v41 = vmul.f32 %v2037_v39, %v2037_v39  ;;  %v1937_v42 = vpop.f32.mrb[6].mxu0  ;;  %1121 = vrot.lane.b32.xlu1 %v1103_v36, %s2150_s0  ;;  %v1853_v44 = vpop.f32.mrb[6].mxu1 }
 0x1a8   :  { %v2038_v62 = vadd.f32 %v1937_v42, %v1853_v44  ;;  %v686_v1 = vpop.f32.mrb[7].mxu1  ;;  %v1082_v4 = vpop.f32.mrb[7].mxu0  ;;  %v1106_v18 = vmul.f32 0.04761905, %v1097_v54 }
 0x1a9   :  { %v1105_v21 = vmul.f32 0.04761905, %v1096_v41  ;;  %v2039_v24 = vadd.f32 %v1082_v4, %v686_v1 }
 0x1aa   :  { %v1099_v25 = vmul.f32 %v2038_v62, %v2038_v62 }
 0x1ab   :  { %v1098_v13 = vmul.f32 %v2039_v24, %v2039_v24  ;;  %1125 = vrot.lane.b32.xlu1 %v1105_v21, %s2150_s0 }
 0x1ac   :  { %v1108_v22 = vmul.f32 0.04761905, %v1099_v25 }
 0x1ad   :  { %v1107_v50 = vmul.f32 0.04761905, %v1098_v13 }
 0x1ae   :  { %1131 = vrot.lane.b32.xlu0 %v1108_v22, %s2150_s0 }
 0x1af   :  { %1129 = vrot.lane.b32.xlu1 %v1107_v50, %s2150_s0 }
 0x1b2   :  { %1123 = vrot.lane.b32.xlu0 %v1104_v52, %s2150_s0 }
 0x1b6   :  { %1127 = vrot.lane.b32.xlu0 %v1106_v18, %s2150_s0 }
 0x219   :  { %v1122_v28 = vpop.permute.xlu1 %1121 }
 0x21a   :  { %v1143_v55 = vsub.f32 %v2035_v19, %v1122_v28 }
 0x21c   :  { %v1152_v45 = vmul.f32 0.05, %v1143_v55 }
 0x21d   :  { %v1126_v15 = vpop.permute.xlu1 %1125 }
 0x21e   :  { %v1160_v16 = vmax.f32 %v1152_v45, 1e-12  ;;  %v1145_v33 = vsub.f32 %v2037_v39, %v1126_v15 }
 0x220   :  { %2094 = vrsqrt.f32 %v1160_v16  ;;  %v1154_v17 = vmul.f32 0.05, %v1145_v33  ;;  %v1132_v58 = vpop.permute.xlu0 %1131  ;;  %vm1182_vm13 = vcmp.eq.f32.partialorder %v1160_v16, inf  ;;  %v1185_v53 = vand.u32 2147483648, %v1160_v16 }
 0x221   :  { %v1148_v29 = vsub.f32 %v2038_v62, %v1132_v58  ;;  %v1130_v63 = vpop.permute.xlu1 %1129  ;;  %vm1184_vm14 = vcmp.eq.f32.partialorder %v1160_v16, 0.0 }
 0x222   :  { %v1162_v27 = vmax.f32 %v1154_v17, 1e-12  ;;  %v1147_v61 = vsub.f32 %v2039_v24, %v1130_v63 }
 0x223   :  { %v1157_v0 = vmul.f32 0.05, %v1148_v29 }
 0x224   :  { %2096 = vrsqrt.f32 %v1162_v27  ;;  %v1156_v9 = vmul.f32 0.05, %v1147_v61  ;;  %v1124_v11 = vpop.permute.xlu0 %1123  ;;  %vm1196_vm15 = vcmp.eq.f32.partialorder %v1162_v27, inf  ;;  %v1199_v14 = vand.u32 2147483648, %v1162_v27 }
 0x225   :  { %v1165_v40 = vmax.f32 %v1157_v0, 1e-12  ;;  %v1144_v7 = vsub.f32 %v2034_v6, %v1124_v11  ;;  %vm1198_vm1 = vcmp.eq.f32.partialorder %v1162_v27, 0.0  ;;  %v2152_v11 = vmov 0.0  }
 0x226   :  { %v1164_v12 = vmax.f32 %v1156_v9, 1e-12 }
 0x227   :  { %2098 = vrsqrt.f32 %v1165_v40  ;;  %v1153_v20 = vmul.f32 0.05, %v1144_v7  ;;  %vm1217_vm2 = vcmp.eq.f32.partialorder %v1165_v40, inf  ;;  %v1220_v35 = vand.u32 2147483648, %v1165_v40 }
 0x228   :  { %2100 = vrsqrt.f32 %v1164_v12  ;;  %v1128_v26 = vpop.permute.xlu0 %1127  ;;  %vm1219_vm3 = vcmp.eq.f32.partialorder %v1165_v40, 0.0  ;;  %vm1210_vm4 = vcmp.eq.f32.partialorder %v1164_v12, inf  ;;  %v1213_v41 = vand.u32 2147483648, %v1164_v12 }
 0x229   :  { %v1161_v38 = vmax.f32 %v1153_v20, 1e-12  ;;  %v1146_v43 = vsub.f32 %v2036_v32, %v1128_v26  ;;  %vm1212_vm5 = vcmp.eq.f32.partialorder %v1164_v12, 0.0 }
 0x22a   :  { %v2095_v47 = vpop.eup %2094 }
 0x22b   :  { %2102 = vrsqrt.f32 %v1161_v38  ;;  %v1155_v48 = vmul.f32 0.05, %v1146_v43  ;;  %v1181_v49 = vmul.f32 %v2095_v47, %v1160_v16  ;;  %vm1189_vm6 = vcmp.eq.f32.partialorder %v1161_v38, inf }
 0x22c   :  { %v1192_v25 = vand.u32 2147483648, %v1161_v38  ;;  %vm1191_vm7 = vcmp.eq.f32.partialorder %v1161_v38, 0.0  ;;  %v53_v43 = vadd.s32 16, %v2204_v10 }
 0x22d   :  { %v1163_v57 = vmax.f32 %v1155_v48, 1e-12  ;;  %v1183_v59 = vsel %vm1182_vm13, %v1160_v16, %v1181_v49  ;;  %v28_v48 = vld [vmem:[%s2790_s1 + $0x10] sm:$0xff] }
 0x22e   :  { %v2097_v3 = vpop.eup %2096  ;;  %v1186_v5 = vsel %vm1184_vm14, %v1185_v53, %v1183_v59  ;;  %vm61_vm10 = vcmp.ge.s32.totalorder %v53_v43, 20  ;;  %v33_v59 = vld [vmem:[%s2790_s1 + $0x38] sm:$0xff] }
 0x22f   :  { %2104 = vrsqrt.f32 %v1163_v57  ;;  %v1232_v6 = vadd.f32 1e-12, %v1186_v5  ;;  %v1195_v8 = vmul.f32 %v2097_v3, %v1162_v27  ;;  %vm1203_vm8 = vcmp.eq.f32.partialorder %v1163_v57, inf }
 0x230   :  { %v1206_v18 = vand.u32 2147483648, %v1163_v57  ;;  %vm1205_vm9 = vcmp.eq.f32.partialorder %v1163_v57, 0.0  ;;  %v2530_v47 = vsel %vm61_vm10, 1.0, %v2152_v11 }
 0x231   :  { %v2099_v19 = vpop.eup %2098  ;;  %2106 = vrcp.f32 %v1232_v6  ;;  %v1197_v23 = vsel %vm1196_vm15, %v1162_v27, %v1195_v8  ;;  %vm1224_vm11 = vcmp.gt.f32.partialorder %v2530_v47, 0.0  ;;  %v30_v6 = vld [vmem:[%s2790_s1 + $0x20] sm:$0xff] }
 0x232   :  { %v2101_v30 = vpop.eup %2100  ;;  %v1200_v31 = vsel %vm1198_vm1, %v1199_v14, %v1197_v23  ;;  %v1216_v32 = vmul.f32 %v2099_v19, %v1165_v40  ;;  %vm1649_vm1 = vcmask 0  }
 0x233   :  { %v1234_v34 = vadd.f32 1e-12, %v1200_v31  ;;  %v1209_v36 = vmul.f32 %v2101_v30, %v1164_v12  ;;  %v29_v31 = vld [vmem:[%s2790_s1 + $0x18] sm:$0xff] }
 0x234   :  { %v1218_v39 = vsel %vm1217_vm2, %v1165_v40, %v1216_v32  ;;  %v1318_v40 = vrot.slane %v2152_v11, 7 }
 0x235   :  { %v2103_v42 = vpop.eup %2102  ;;  %2108 = vrcp.f32 %v1234_v34  ;;  %v1221_v44 = vsel %vm1219_vm3, %v1220_v35, %v1218_v39  ;;  %v1211_v62 = vsel %vm1210_vm4, %v1164_v12, %v1209_v36 }
 0x236   :  { %v1237_v1 = vadd.f32 1e-12, %v1221_v44  ;;  %v1214_v4 = vsel %vm1212_vm5, %v1213_v41, %v1211_v62  ;;  %v1188_v21 = vmul.f32 %v2103_v42, %v1161_v38  ;;  %v1367_v7 = vsub.f32 0.0, %v1318_v40  ;;  %v32_v41 = vld [vmem:[%s2790_s1 + $0x30] sm:$0xff]  ;;  %v31_v44 = vld [vmem:[%s2790_s1 + $0x28] sm:$0xff] }
 0x237   :  { %v1236_v24 = vadd.f32 1e-12, %v1214_v4  ;;  %v1335_v20 = vmul.f32 %v1318_v40, %v2268_v60 }
 0x238   :  { %2110 = vrcp.f32 %v1237_v1  ;;  %v1190_v13 = vsel %vm1189_vm6, %v1161_v38, %v1188_v21  ;;  %v1375_v12 = vand.u32 2147483647, %v1367_v7 }
 0x239   :  { %v2105_v37 = vpop.eup %2104  ;;  %2112 = vrcp.f32 %v1236_v24  ;;  %v1193_v22 = vsel %vm1191_vm7, %v1192_v25, %v1190_v13  ;;  %v1345_v38 = vsel %vm220_vm12, %v1335_v20, 0.0 }
 0x23a   :  { %v1233_v50 = vadd.f32 1e-12, %v1193_v22  ;;  %v1202_v52 = vmul.f32 %v2105_v37, %v1163_v57  ;;  %v1385_v26 = vsel %vm220_vm12, %v1375_v12, 0.0 }
 0x23b   :  { %v2107_v54 = vpop.eup %2106 }
 0x23c   :  { %v1243_v28 = vmul.f32 0.15, %v2107_v54  ;;  %2114 = vrcp.f32 %v1233_v50  ;;  %v1204_v55 = vsel %vm1203_vm8, %v1163_v57, %v1202_v52 }
 0x23d   :  { %v1207_v45 = vsel %vm1205_vm9, %v1206_v18, %v1204_v55 }
 0x23e   :  { %1266 = vrot.lane.b32.xlu1 %v1243_v28, %s2151_s3  ;;  %v1235_v15 = vadd.f32 1e-12, %v1207_v45 }
 0x23f   :  { %v2109_v16 = vpop.eup %2108 }
 0x240   :  { %v1247_v33 = vmul.f32 0.15, %v2109_v16  ;;  %2116 = vrcp.f32 %v1235_v15 }
 0x242   :  { %v2111_v17 = vpop.eup %2110  ;;  %1270 = vrot.lane.b32.xlu1 %v1247_v33, %s2151_s3 }
 0x243   :  { %v2113_v58 = vpop.eup %2112  ;;  %v1253_v29 = vmul.f32 0.15, %v2111_v17 }
 0x244   :  { %v1251_v63 = vmul.f32 0.15, %v2113_v58 }
 0x245   :  { %1276 = vrot.lane.b32.xlu0 %v1253_v29, %s2151_s3 }
 0x246   :  { %v2115_v27 = vpop.eup %2114  ;;  %1274 = vrot.lane.b32.xlu1 %v1251_v63, %s2151_s3 }
 0x247   :  { %v1245_v61 = vmul.f32 0.15, %v2115_v27 }
 0x249   :  { %1268 = vrot.lane.b32.xlu0 %v1245_v61, %s2151_s3 }
 0x24a   :  { %v2117_v0 = vpop.eup %2116 }
 0x24b   :  { %v1249_v9 = vmul.f32 0.15, %v2117_v0 }
 0x24d   :  { %1272 = vrot.lane.b32.xlu0 %v1249_v9, %s2151_s3 }
 0x26a   :  { %1386 = vadd.xlane.f32.xlu1 %v1385_v26  ;;  %v2804_v26 = vld [vmem:[#allocation5_spill] sm:$0xff] }
 0x26c   :  { %1346 = vadd.xlane.f32.xlu0 %v1345_v38 }
 0x2b0   :  { %v1267_v49 = vpop.permute.xlu1 %1266 }
 0x2b1   :  { %v1288_v53 = vmul.f32 %v1267_v49, %v28_v48  ;;  %v2805_v49 = vld [vmem:[#allocation7_spill] sm:$0xff] }
 0x2b3   :  { %v1312_v60 = vsel %vm1224_vm11, %v1288_v53, 0.0 }
 0x2b4   :  { %v1320_v57 = vrot.slane %v1312_v60, 7  ;;  %v1271_v3 = vpop.permute.xlu1 %1270 }
 0x2b5   :  { %v1290_v34 = vmul.f32 %v1271_v3, %v30_v6 }
 0x2b6   :  { %v1331_v5 = vsel %vm91_vm0, %v1318_v40, %v1320_v57 }
 0x2b7   :  { %v1277_v8 = vpop.permute.xlu0 %1276  ;;  %v1336_v14 = vmul.f32 %v1331_v5, %v2251_v46  ;;  %v1368_v19 = vsub.f32 %v1312_v60, %v1331_v5  ;;  %v1322_v62 = vrot.slane %v1290_v34, 7 }
 0x2b8   :  { %v1293_v23 = vmul.f32 %v1277_v8, %v33_v59  ;;  %v1275_v46 = vpop.permute.xlu1 %1274 }
 0x2b9   :  { %v1348_v30 = vsel %vm220_vm12, %v1336_v14, 0.0  ;;  %v1376_v32 = vand.u32 2147483647, %v1368_v19  ;;  %v1292_v4 = vmul.f32 %v1275_v46, %v32_v41 }
 0x2ba   :  { %1349 = vadd.xlane.f32.xlu0 %v1348_v30  ;;  %v1325_v39 = vrot.slane %v1293_v23, 7 }
 0x2bb   :  { %v1269_v35 = vpop.permute.xlu0 %1268  ;;  %v1388_v36 = vsel %vm220_vm12, %v1376_v32, 0.0  ;;  %v1324_v15 = vrot.slane %v1292_v4, 7 }
 0x2bc   :  { %v1289_v42 = vmul.f32 %v1269_v35, %v29_v31  ;;  %1389 = vadd.xlane.f32.xlu1 %v1388_v36  ;;  %v1333_v13 = vsel %vm91_vm0, %v1325_v39, %v1318_v40 }
 0x2bd   :  { %v1334_v55 = vmul.f32 %v1333_v13, %v2255_v51  ;;  %v1366_v45 = vsub.f32 0.0, %v1333_v13  ;;  %v1326_v0 = vsel %vm91_vm0, %v1324_v15, %v1325_v39 }
 0x2be   :  { %v1321_v1 = vrot.slane %v1289_v42, 7  ;;  %v1373_v12 = vsub.f32 %v1293_v23, %v1326_v0 }
 0x2bf   :  { %v1273_v21 = vpop.permute.xlu0 %1272  ;;  %v1342_v29 = vsel %vm220_vm12, %v1334_v55, 0.0  ;;  %v1374_v63 = vand.u32 2147483647, %v1366_v45 }
 0x2c0   :  { %v1330_v24 = vsel %vm91_vm0, %v1320_v57, %v1321_v1  ;;  %v1291_v25 = vmul.f32 %v1273_v21, %v31_v44  ;;  %v1329_v37 = vsel %vm91_vm0, %v1321_v1, %v1322_v62  ;;  %v1381_v48 = vand.u32 2147483647, %v1373_v12  ;;  %v2806_v57 = vld [vmem:[#allocation6_spill] sm:$0xff] }
 0x2c1   :  { %v1369_v22 = vsub.f32 %v1289_v42, %v1330_v24  ;;  %v1337_v50 = vmul.f32 %v1330_v24, %v2261_v56  ;;  %v1370_v52 = vsub.f32 %v1290_v34, %v1329_v37  ;;  %v1382_v9 = vsel %vm220_vm12, %v1374_v63, 0.0 }
 0x2c2   :  { %v1323_v54 = vrot.slane %v1291_v25, 7  ;;  %v1338_v11 = vmul.f32 %v1329_v37, %v2278_v2  ;;  %v1403_v2 = vsel %vm220_vm12, %v1381_v48, 0.0  ;;  %v1341_v59 = vmul.f32 %v1326_v0, %v2806_v57  ;;  %v2649_v57 = vld [vmem:[%s2791_s2 + $0x20] sm:$0xff] }
 0x2c3   :  { %v1351_v18 = vsel %vm220_vm12, %v1337_v50, 0.0  ;;  %v1377_v28 = vand.u32 2147483647, %v1369_v22  ;;  %v1378_v58 = vand.u32 2147483647, %v1370_v52 }
 0x2c4   :  { %v1328_v16 = vsel %vm91_vm0, %v1322_v62, %v1323_v54  ;;  %1352 = vadd.xlane.f32.xlu0 %v1351_v18  ;;  %v1327_v56 = vsel %vm91_vm0, %v1323_v54, %v1324_v15  ;;  %v1354_v20 = vsel %vm220_vm12, %v1338_v11, 0.0  ;;  %v1363_v3 = vsel %vm220_vm12, %v1341_v59, 0.0 }
 0x2c5   :  { %v1371_v33 = vsub.f32 %v1291_v25, %v1328_v16  ;;  %v1391_v17 = vsel %vm220_vm12, %v1377_v28, 0.0  ;;  %v1394_v51 = vsel %vm220_vm12, %v1378_v58, 0.0  ;;  %v1372_v61 = vsub.f32 %v1292_v4, %v1327_v56 }
 0x2c6   :  { %1392 = vadd.xlane.f32.xlu1 %v1391_v17  ;;  %v1339_v38 = vmul.f32 %v1328_v16, %v2804_v26  ;;  %v1340_v53 = vmul.f32 %v1327_v56, %v2805_v49  ;;  %vm1430_vm0 = vcmask 7168   ;;  %v2627_v26 = vld [vmem:[%s2791_s2 + $0x8] sm:$0xff]  ;;  %v2641_v49 = vld [vmem:[%s2791_s2 + $0x18] sm:$0xff] }
 0x2c7   :  { %v1379_v27 = vand.u32 2147483647, %v1371_v33  ;;  %v1380_v7 = vand.u32 2147483647, %v1372_v61  ;;  %v1517_v48 = vmul.f32 0.0, %v2627_v26 }
 0x2c8   :  { %1343 = vadd.xlane.f32.xlu0 %v1342_v29  ;;  %v1357_v10 = vsel %vm220_vm12, %v1339_v38, 0.0  ;;  %v1360_v60 = vsel %vm220_vm12, %v1340_v53, 0.0  ;;  %v2632_v38 = vld [vmem:[%s2791_s2 + $0x10] sm:$0xff] }
 0x2c9   :  { %v1397_v40 = vsel %vm220_vm12, %v1379_v27, 0.0  ;;  %v1400_v43 = vsel %vm220_vm12, %v1380_v7, 0.0 }
 0x2ca   :  { %1395 = vadd.xlane.f32.xlu1 %v1394_v51 }
 0x2cc   :  { %1383 = vadd.xlane.f32.xlu0 %v1382_v9 }
 0x2ce   :  { %1398 = vadd.xlane.f32.xlu1 %v1397_v40 }
 0x2d0   :  { %1355 = vadd.xlane.f32.xlu0 %v1354_v20  ;;  %v2622_v20 = vld [vmem:[%s2791_s2] sm:$0xff] }
 0x2d2   :  { %1401 = vadd.xlane.f32.xlu1 %v1400_v43  ;;  %v1516_v43 = vmul.f32 0.0, %v2622_v20 }
 0x2d4   :  { %1358 = vadd.xlane.f32.xlu0 %v1357_v10  ;;  %v1518_v10 = vmul.f32 %v2530_v47, %v2632_v38  ;;  %v1524_v53 = vsel %vm1430_vm0, %v1516_v43, 0.0 }
 0x2d6   :  { %1404 = vadd.xlane.f32.xlu1 %v1403_v2  ;;  %v1525_v2 = vsel %vm1430_vm0, %v1517_v48, 0.0 }
 0x2d7   :  { %v1526_v59 = vadd.f32 %v1525_v2, %v1524_v53 }
 0x2d8   :  { %1361 = vadd.xlane.f32.xlu0 %v1360_v60  ;;  %v1527_v60 = vsel %vm1430_vm0, %v1518_v10, 0.0 }
 0x2dc   :  { %1364 = vadd.xlane.f32.xlu0 %v1363_v3  ;;  %v1529_v3 = vsel %vm1430_vm0, %v2641_v49, 0.0 }
 0x2f7   :  { %v1387_v6 = vpop.xlane.xlu1 %1386 }
 0x2f8   :  { %v1407_v30 = vmul.f32 0.001, %v1387_v6  ;;  %v1528_v6 = vadd.f32 %v1527_v60, %v1526_v59 }
 0x2f9   :  { %v1347_v5 = vpop.xlane.xlu0 %1346 }
 0x2fa   :  { %v1415_v35 = vsub.f32 %v1347_v5, %v1407_v30  ;;  %v2656_v5 = vld [vmem:[%s2791_s2 + $0x28] sm:$0xff]  ;;  %v2670_v30 = vld [vmem:[%s2791_s2 + $0x38] sm:$0xff] }
 0x2fc   :  { %v2586_v42 = vmul.f32 0.0, %v1415_v35  ;;  %v1537_v35 = vsel %vm1430_vm0, %v2670_v30, 0.0 }
 0x2fe   :  { %v1432_v25 = vsel %vm1430_vm0, %v2586_v42, 0.0 }
 0x347   :  { %v1350_v8 = vpop.xlane.xlu0 %1349 }
 0x349   :  { %v1390_v14 = vpop.xlane.xlu1 %1389 }
 0x34a   :  { %v1408_v32 = vmul.f32 0.001, %v1390_v14  ;;  %v2663_v14 = vld [vmem:[%s2791_s2 + $0x30] sm:$0xff] }
 0x34c   :  { %v1416_v39 = vsub.f32 %v1350_v8, %v1408_v32  ;;  %v1531_v8 = vsel %vm1430_vm0, %v2649_v57, 0.0  ;;  %v1535_v32 = vsel %vm1430_vm0, %v2663_v14, 0.0 }
 0x34e   :  { %v2589_v4 = vmul.f32 %v2530_v47, %v1416_v39 }
 0x350   :  { %v1434_v54 = vsel %vm1430_vm0, %v2589_v4, 0.0 }
 0x351   :  { %v1353_v19 = vpop.xlane.xlu0 %1352 }
 0x353   :  { %v1393_v23 = vpop.xlane.xlu1 %1392 }
 0x354   :  { %v1409_v44 = vmul.f32 0.001, %v1393_v23  ;;  %v1533_v23 = vsel %vm1430_vm0, %v2656_v5, 0.0 }
 0x355   :  { %v1344_v31 = vpop.xlane.xlu0 %1343 }
 0x356   :  { %v2595_v13 = vsub.f32 %v1353_v19, %v1409_v44  ;;  %v1530_v19 = vadd.f32 %v1529_v3, %v1528_v6 }
 0x357   :  { %v1396_v34 = vpop.xlane.xlu1 %1395 }
 0x358   :  { %v1410_v37 = vmul.f32 0.001, %v1396_v34  ;;  %v1436_v45 = vsel %vm1430_vm0, %v2595_v13, 0.0 }
 0x359   :  { %v1384_v36 = vpop.xlane.xlu0 %1383 }
 0x35a   :  { %v1406_v41 = vmul.f32 0.001, %v1384_v36 }
 0x35b   :  { %v1399_v46 = vpop.xlane.xlu1 %1398 }
 0x35c   :  { %v1414_v62 = vsub.f32 %v1344_v31, %v1406_v41  ;;  %v1411_v18 = vmul.f32 0.001, %v1399_v46  ;;  %v1532_v31 = vadd.f32 %v1531_v8, %v1530_v19 }
 0x35d   :  { %v1356_v1 = vpop.xlane.xlu0 %1355 }
 0x35e   :  { %v2591_v21 = vmul.f32 0.0, %v1414_v62  ;;  %v2601_v28 = vsub.f32 %v1356_v1, %v1410_v37  ;;  %v1534_v34 = vadd.f32 %v1533_v23, %v1532_v31 }
 0x35f   :  { %v1402_v24 = vpop.xlane.xlu1 %1401 }
 0x360   :  { %v1431_v22 = vsel %vm1430_vm0, %v2591_v21, 0.0  ;;  %v1412_v15 = vmul.f32 0.001, %v1402_v24  ;;  %v1438_v56 = vsel %vm1430_vm0, %v2601_v28, 0.0  ;;  %v1536_v36 = vadd.f32 %v1535_v32, %v1534_v34 }
 0x361   :  { %v1433_v50 = vadd.f32 %v1432_v25, %v1431_v22  ;;  %v1359_v52 = vpop.xlane.xlu0 %1358 }
 0x362   :  { %v2605_v16 = vsub.f32 %v1359_v52, %v1411_v18  ;;  %v1538_v39 = vadd.f32 %v1537_v35, %v1536_v36 }
 0x363   :  { %v1435_v55 = vadd.f32 %v1434_v54, %v1433_v50  ;;  %v1405_v17 = vpop.xlane.xlu1 %1404 }
 0x364   :  { %v1440_v51 = vsel %vm1430_vm0, %v2605_v16, 0.0  ;;  %v1413_v27 = vmul.f32 0.001, %v1405_v17 }
 0x365   :  { %v1437_v33 = vadd.f32 %v1436_v45, %v1435_v55  ;;  %v1362_v58 = vpop.xlane.xlu0 %1361 }
 0x366   :  { %v2609_v29 = vsub.f32 %v1362_v58, %v1412_v15 }
 0x367   :  { %v1439_v63 = vadd.f32 %v1438_v56, %v1437_v33 }
 0x368   :  { %v1442_v9 = vsel %vm1430_vm0, %v2609_v29, 0.0 }
 0x369   :  { %v1441_v61 = vadd.f32 %v1440_v51, %v1439_v63  ;;  %v1365_v0 = vpop.xlane.xlu0 %1364 }
 0x36a   :  { %v2615_v11 = vsub.f32 %v1365_v0, %v1413_v27 }
 0x36b   :  { %v1443_v40 = vadd.f32 %v1442_v9, %v1441_v61 }
 0x36c   :  { %v1444_v7 = vsel %vm1430_vm0, %v2615_v11, 0.0 }
 0x36d   :  { %v1445_v12 = vadd.f32 %v1444_v7, %v1443_v40 }
 0x36f   :  { %1446 = vadd.xlane.f32.xlu1 %v1445_v12 }
 0x373   :  { %1539 = vadd.xlane.f32.xlu1 %v1538_v39 }
 0x3fc   :  { %v1447_v41 = vpop.xlane.xlu1 %1446 }
 0x3fd   :  { %v1448_v46 = vrot.slane %v1447_v41, 4 }
 0x3ff   :  { %v1449_v44 = vadd.f32 %v1448_v46, %v1447_v41 }
 0x400   :  { %v1540_v59 = vpop.xlane.xlu1 %1539 }
 0x401   :  { %v1450_v62 = vrot.slane %v1449_v44, 2  ;;  %v1541_v3 = vrot.slane %v1540_v59, 4 }
 0x403   :  { %v1451_v1 = vadd.f32 %v1450_v62, %v1449_v44  ;;  %v1542_v6 = vadd.f32 %v1541_v3, %v1540_v59 }
 0x405   :  { %v1452_v24 = vrot.slane %v1451_v1, 1  ;;  %v1543_v8 = vrot.slane %v1542_v6, 2 }
 0x407   :  { %v1453_v25 = vadd.f32 %v1452_v24, %v1451_v1  ;;  %v1544_v32 = vadd.f32 %v1543_v8, %v1542_v6 }
 0x409   :  { %2064 = vpush %v1453_v25  ;;  %v1545_v36 = vrot.slane %v1544_v32, 1 }
 0x40b   :  { %v1546_v46 = vadd.f32 %v1545_v36, %v1544_v32 }
 0x43a   :  { %s2065_s2 = spop %2064 }
 0x43b   :  { %v1455_v37 = vstv %s2065_s2 }
 0x43c   :  { %v2676_v22 = vmul.f32 0.022727273, %v1455_v37 }
 0x43e   :  { %v1458_v50 = vsub.f32 %v2591_v21, %v2676_v22  ;;  %v1459_v52 = vsub.f32 %v2586_v42, %v2676_v22  ;;  %v1460_v54 = vsub.f32 %v2589_v4, %v2676_v22  ;;  %v2686_v18 = vsub.f32 %v2595_v13, %v2676_v22 }
 0x43f   :  { %v2697_v21 = vsub.f32 %v2601_v28, %v2676_v22  ;;  %v2707_v33 = vsub.f32 %v2605_v16, %v2676_v22  ;;  %v2715_v63 = vsub.f32 %v2609_v29, %v2676_v22  ;;  %v2722_v16 = vsub.f32 %v2615_v11, %v2676_v22 }
 0x440   :  { %v2688_v55 = vmul.f32 0.0, %v1458_v50  ;;  %v2690_v45 = vmul.f32 0.0, %v1459_v52  ;;  %v2693_v15 = vmul.f32 %v2530_v47, %v1460_v54  ;;  %v1477_v17 = vmul.f32 %v2686_v18, %v2686_v18 }
 0x441   :  { %v1478_v51 = vmul.f32 %v2697_v21, %v2697_v21  ;;  %v1479_v0 = vmul.f32 %v2707_v33, %v2707_v33  ;;  %v1480_v29 = vmul.f32 %v2715_v63, %v2715_v63  ;;  %v1481_v43 = vmul.f32 %v2722_v16, %v2722_v16 }
 0x442   :  { %v1474_v42 = vmul.f32 %v2688_v55, %v2688_v55  ;;  %v1475_v4 = vmul.f32 %v2690_v45, %v2690_v45  ;;  %v1476_v13 = vmul.f32 %v2693_v15, %v2693_v15  ;;  %v1487_v9 = vsel %vm1430_vm0, %v1477_v17, 0.0 }
 0x443   :  { %v1489_v7 = vsel %vm1430_vm0, %v1478_v51, 0.0  ;;  %v1491_v48 = vsel %vm1430_vm0, %v1479_v0, 0.0  ;;  %v1493_v11 = vsel %vm1430_vm0, %v1480_v29, 0.0  ;;  %v1495_v2 = vsel %vm1430_vm0, %v1481_v43, 0.0 }
 0x444   :  { %v1482_v58 = vsel %vm1430_vm0, %v1474_v42, 0.0  ;;  %v1483_v28 = vsel %vm1430_vm0, %v1475_v4, 0.0  ;;  %v1485_v27 = vsel %vm1430_vm0, %v1476_v13, 0.0 }
 0x445   :  { %v1484_v56 = vadd.f32 %v1483_v28, %v1482_v58 }
 0x447   :  { %v1486_v61 = vadd.f32 %v1485_v27, %v1484_v56 }
 0x449   :  { %v1488_v40 = vadd.f32 %v1487_v9, %v1486_v61 }
 0x44b   :  { %v1490_v12 = vadd.f32 %v1489_v7, %v1488_v40 }
 0x44d   :  { %v1492_v10 = vadd.f32 %v1491_v48, %v1490_v12 }
 0x44f   :  { %v1494_v53 = vadd.f32 %v1493_v11, %v1492_v10 }
 0x451   :  { %v1496_v60 = vadd.f32 %v1495_v2, %v1494_v53 }
 0x453   :  { %1497 = vadd.xlane.f32.xlu0 %v1496_v60 }
 0x4e0   :  { %v1498_v19 = vpop.xlane.xlu0 %1497 }
 0x4e1   :  { %v1499_v23 = vrot.slane %v1498_v19, 4 }
 0x4e3   :  { %v1500_v31 = vadd.f32 %v1499_v23, %v1498_v19 }
 0x4e5   :  { %v1501_v34 = vrot.slane %v1500_v31, 2 }
 0x4e7   :  { %v1502_v35 = vadd.f32 %v1501_v34, %v1500_v31 }
 0x4e9   :  { %v1503_v39 = vrot.slane %v1502_v35, 1 }
 0x4eb   :  { %v1504_v41 = vadd.f32 %v1503_v39, %v1502_v35 }
 0x4ed   :  { %2066 = vpush %v1504_v41 }
 0x4ee   :  { %2068 = vpush %v1546_v46 }
 0x51e   :  { %s2735_s3 = spop %2066 }
 0x51f   :  { %v1506_v44 = vstv %s2735_s3  ;;  %s2069_s21 = spop %2068 }
 0x520   :  { %v1508_v62 = vmul.f32 0.023255814, %v1506_v44  ;;  %v1548_v1 = vstv %s2069_s21 }
 0x521   :  { %v1549_v24 = vmul.f32 0.022727273, %v1548_v1 }
 0x522   :  { %2118 = vrsqrt.f32 %v1508_v62  ;;  %vm1511_vm12 = vcmp.eq.f32.partialorder %v1508_v62, inf  ;;  %vm1513_vm13 = vcmp.eq.f32.partialorder %v1508_v62, 0.0 }
 0x523   :  { %v1550_v25 = vsub.f32 %v2622_v20, %v1549_v24  ;;  %v1551_v37 = vsub.f32 %v2627_v26, %v1549_v24  ;;  %v1552_v50 = vsub.f32 %v2632_v38, %v1549_v24  ;;  %v1553_v52 = vsub.f32 %v2641_v49, %v1549_v24 }
 0x524   :  { %v1554_v13 = vsub.f32 %v2649_v57, %v1549_v24  ;;  %v1555_v56 = vsub.f32 %v2656_v5, %v1549_v24  ;;  %v1514_v49 = vand.u32 2147483648, %v1508_v62  ;;  %v1556_v57 = vsub.f32 %v2663_v14, %v1549_v24 }
 0x525   :  { %v1558_v54 = vmul.f32 0.0, %v1550_v25  ;;  %v1559_v42 = vmul.f32 0.0, %v1551_v37  ;;  %v1560_v4 = vmul.f32 %v2530_v47, %v1552_v50  ;;  %v1603_v51 = vmul.f32 %v1553_v52, %v1553_v52 }
 0x526   :  { %v1557_v0 = vsub.f32 %v2670_v30, %v1549_v24  ;;  %v1604_v9 = vmul.f32 %v1554_v13, %v1554_v13  ;;  %v1569_v7 = vmul.f32 %v1553_v52, %v2686_v18  ;;  %v1605_v48 = vmul.f32 %v1555_v56, %v1555_v56 }
 0x527   :  { %v1600_v17 = vmul.f32 %v1558_v54, %v1558_v54  ;;  %v1601_v58 = vmul.f32 %v1559_v42, %v1559_v42  ;;  %v1602_v28 = vmul.f32 %v1560_v4, %v1560_v4  ;;  %v1566_v38 = vmul.f32 %v1558_v54, %v2688_v55 }
 0x528   :  { %v1567_v61 = vmul.f32 %v1559_v42, %v2690_v45  ;;  %v1568_v47 = vmul.f32 %v1560_v4, %v2693_v15  ;;  %v1613_v45 = vsel %vm1430_vm0, %v1603_v51, 0.0  ;;  %v1570_v14 = vmul.f32 %v1554_v13, %v2697_v21 }
 0x529   :  { %v1608_v20 = vsel %vm1430_vm0, %v1600_v17, 0.0  ;;  %v1609_v26 = vsel %vm1430_vm0, %v1601_v58, 0.0  ;;  %v1611_v5 = vsel %vm1430_vm0, %v1602_v28, 0.0  ;;  %v1574_v12 = vsel %vm1430_vm0, %v1566_v38, 0.0 }
 0x52a   :  { %v1610_v27 = vadd.f32 %v1609_v26, %v1608_v20  ;;  %v1575_v55 = vsel %vm1430_vm0, %v1567_v61, 0.0  ;;  %v1577_v30 = vsel %vm1430_vm0, %v1568_v47, 0.0  ;;  %v1606_v11 = vmul.f32 %v1556_v57, %v1556_v57 }
 0x52b   :  { %v1576_v15 = vadd.f32 %v1575_v55, %v1574_v12  ;;  %v1615_v53 = vsel %vm1430_vm0, %v1604_v9, 0.0  ;;  %v1571_v59 = vmul.f32 %v1555_v56, %v2707_v33  ;;  %v1579_v3 = vsel %vm1430_vm0, %v1569_v7, 0.0 }
 0x52c   :  { %v2119_v40 = vpop.eup %2118  ;;  %v1612_v29 = vadd.f32 %v1611_v5, %v1610_v27  ;;  %v1607_v8 = vmul.f32 %v1557_v0, %v1557_v0  ;;  %v1617_v19 = vsel %vm1430_vm0, %v1605_v48, 0.0  ;;  %v1572_v31 = vmul.f32 %v1556_v57, %v2715_v63 }
 0x52d   :  { %v1510_v43 = vmul.f32 %v2119_v40, %v1508_v62  ;;  %v1578_v2 = vadd.f32 %v1577_v30, %v1576_v15  ;;  %v1581_v32 = vsel %vm1430_vm0, %v1570_v14, 0.0  ;;  %v1619_v34 = vsel %vm1430_vm0, %v1606_v11, 0.0 }
 0x52e   :  { %v1614_v10 = vadd.f32 %v1613_v45, %v1612_v29  ;;  %v1573_v39 = vmul.f32 %v1557_v0, %v2722_v16  ;;  %v1583_v33 = vsel %vm1430_vm0, %v1571_v59, 0.0  ;;  %v1621_v41 = vsel %vm1430_vm0, %v1607_v8, 0.0 }
 0x52f   :  { %v1512_v18 = vsel %vm1511_vm12, %v1508_v62, %v1510_v43  ;;  %v1580_v23 = vadd.f32 %v1579_v3, %v1578_v2  ;;  %v1585_v1 = vsel %vm1430_vm0, %v1572_v31, 0.0  ;;  %v1644_v37 = vsub.f32 0.0, %v2676_v22 }
 0x530   :  { %v1616_v60 = vadd.f32 %v1615_v53, %v1614_v10  ;;  %v1515_v6 = vsel %vm1513_vm13, %v1514_v49, %v1512_v18  ;;  %v1587_v63 = vsel %vm1430_vm0, %v1573_v39, 0.0 }
 0x531   :  { %2120 = vrcp.f32 %v1515_v6  ;;  %v1582_v35 = vadd.f32 %v1581_v32, %v1580_v23 }
 0x532   :  { %v1618_v21 = vadd.f32 %v1617_v19, %v1616_v60 }
 0x533   :  { %v1584_v46 = vadd.f32 %v1583_v33, %v1582_v35 }
 0x534   :  { %v1620_v36 = vadd.f32 %v1619_v34, %v1618_v21 }
 0x535   :  { %v1586_v24 = vadd.f32 %v1585_v1, %v1584_v46 }
 0x536   :  { %v1622_v62 = vadd.f32 %v1621_v41, %v1620_v36 }
 0x537   :  { %v1588_v25 = vadd.f32 %v1587_v63, %v1586_v24 }
 0x538   :  { %1623 = vadd.xlane.f32.xlu1 %v1622_v62 }
 0x539   :  { %1589 = vadd.xlane.f32.xlu0 %v1588_v25 }
 0x53b   :  { %v2121_v50 = vpop.eup %2120 }
 0x53c   :  { %v1646_v52 = vmul.f32 %v2121_v50, %v1644_v37 }
 0x5c5   :  { %v1624_v54 = vpop.xlane.xlu1 %1623 }
 0x5c6   :  { %v1625_v16 = vrot.slane %v1624_v54, 4  ;;  %v1590_v4 = vpop.xlane.xlu0 %1589 }
 0x5c7   :  { %v1591_v13 = vrot.slane %v1590_v4, 4 }
 0x5c8   :  { %v1626_v42 = vadd.f32 %v1625_v16, %v1624_v54 }
 0x5c9   :  { %v1592_v58 = vadd.f32 %v1591_v13, %v1590_v4 }
 0x5ca   :  { %v1627_v17 = vrot.slane %v1626_v42, 2 }
 0x5cb   :  { %v1593_v56 = vrot.slane %v1592_v58, 2 }
 0x5cc   :  { %v1628_v28 = vadd.f32 %v1627_v17, %v1626_v42 }
 0x5cd   :  { %v1594_v20 = vadd.f32 %v1593_v56, %v1592_v58 }
 0x5ce   :  { %v1629_v51 = vrot.slane %v1628_v28, 1 }
 0x5cf   :  { %v1595_v26 = vrot.slane %v1594_v20, 1 }
 0x5d0   :  { %v1630_v38 = vadd.f32 %v1629_v51, %v1628_v28 }
 0x5d1   :  { %v1596_v49 = vadd.f32 %v1595_v26, %v1594_v20 }
 0x5d3   :  { %2070 = vpush %v1596_v49 }
 0x5d4   :  { %2072 = vpush %v1630_v38 }
 0x604   :  { %s2071_s22 = spop %2070 }
 0x605   :  { %s2073_s23 = spop %2072  ;;  %v1598_v40 = vstv %s2071_s22 }
 0x606   :  { %v1632_v22 = vstv %s2073_s23  ;;  %v1599_v29 = vand.u32 2147483647, %v1598_v40 }
 0x607   :  { %v1633_v27 = vmul.f32 %v1632_v22, %v1506_v44 }
 0x609   :  { %v1634_v61 = vadd.f32 1e-12, %v1633_v27 }
 0x60b   :  { %2122 = vrsqrt.f32 %v1634_v61  ;;  %vm1637_vm14 = vcmp.eq.f32.partialorder %v1634_v61, inf  ;;  %v1640_v0 = vand.u32 2147483648, %v1634_v61  ;;  %vm1639_vm15 = vcmp.eq.f32.partialorder %v1634_v61, 0.0 }
 0x615   :  { %v2123_v47 = vpop.eup %2122 }
 0x616   :  { %v1636_v57 = vmul.f32 %v2123_v47, %v1634_v61 }
 0x618   :  { %v1638_v9 = vsel %vm1637_vm14, %v1634_v61, %v1636_v57 }
 0x619   :  { %v1641_v5 = vsel %vm1639_vm15, %v1640_v0, %v1638_v9 }
 0x61a   :  { %2124 = vrcp.f32 %v1641_v5 }
 0x624   :  { %v2125_v7 = vpop.eup %2124 }
 0x625   :  { %v1643_v12 = vmul.f32 %v2125_v7, %v1599_v29 }
 0x627   :  { %v1647_v55 = vmul.f32 0.5, %v1643_v12 }
 0x629   :  { %v1648_v43 = vadd.f32 %v1647_v55, %v1646_v52 }
 0x62b   :  { %1650 = vst.msk [vmem:[#allocation2] sm:$0x1] %vm1649_vm1, %v1648_v43 }
 0x62c   :  { %2137 = shalt.err (!%p2134_p4)
}
 0x62d   :  { %s2138_s30 = scalar_lea.hbm %s2793_s4, 16 }
 0x62e   :  { %p2139_p5 = scmp.ne.s32.totalorder %s2793_s4, %s2138_s30  ;;  %p2142_p6 = scmp.lt.u32.totalorder %s2138_s30, %s2793_s4 }
 0x630   :  { %p2144_p7 = pnand %p2142_p6, %p2139_p5 }
 0x632   :  { %2147 = shalt.err (!%p2144_p7)
}
 0x633   :  { %1660 = dma.vmem_to_hbm [thread:$0]  %s1658_s25, 16, %s2793_s4, [#allocation3]  }
 0x634   :  { %2148 = dma.done.wait [#allocation3], 16  }
 0x635   :  { %2149 = vsyncadd [#allocation3], 4294967280 }
 0x636   :  { %1664 = vsyncpa [#allocation3], 1 }

</bundles_post_ra>
